<compile_context>
chip_gen: v5e
topology: v5e:2x2
jax: 0.10.0
libtpu: 0.0.40
codegen_flags: <defaults>
</compile_context>

<pallas_src>
import math

import jax
import jax.numpy as jnp
from jax.experimental import pallas as pl
from jax.experimental.pallas import tpu as pltpu


def _usable_vmem_bytes() -> int:
    """~75% of per-core physical VMEM; conservative 48 MiB fallback."""
    try:
        cap = int(pltpu.get_tpu_info().vmem_capacity_bytes)
    except Exception:
        cap = 64 << 20
    return max(32 << 20, (cap * 3) // 4)


def _make_fused_kernel(C: int, hw: int, k: int, pad: int, padq: int):
    inv_hw = 1.0 / float(hw)

    def kernel(w_ref, x_ref, o_ref, pbuf_ref):
        # w_ref:    (k,)  f32 conv taps in SMEM (scalar prefetch)
        # x_ref:    (C, hw) one image, native dtype, lane-dense spatial axis
        # o_ref:    (C, hw)
        # pbuf_ref: (C + 2*padq, 1) f32 scratch for the zero-padded pooled vec
        x = x_ref[...]                                              # native dtype
        # Global average pool over H*W with f32 accumulation (no f32 tile copy).
        pooled = jnp.sum(x, axis=-1, keepdims=True,
                         dtype=jnp.float32) * inv_hw                # (C, 1) f32

        # 1-D channel conv == k shifted multiply-adds on the pooled vector.
        # The zeroed scratch supplies the 'same' zero padding; the pooled
        # vector is written at the sublane-aligned offset `padq`, and tap j
        # reads at static offset padq + j - pad.
        pbuf_ref[...] = jnp.zeros_like(pbuf_ref)
        pbuf_ref[pl.ds(padq, C), :] = pooled
        conv = w_ref[0] * pbuf_ref[pl.ds(padq - pad, C), :]
        for j in range(1, k):
            conv = conv + w_ref[j] * pbuf_ref[pl.ds(padq - pad + j, C), :]

        # Sigmoid on the (C, 1) vector only, then rescale in native dtype.
        scale = 1.0 / (1.0 + jnp.exp(-conv))                        # (C, 1) f32
        o_ref[...] = x * scale.astype(o_ref.dtype)

    return kernel


def _fused_path(x3, w, k, pad, usable, fused_need):
    N, C, hw = x3.shape
    padq = ((pad + 7) // 8) * 8            # sublane-aligned write offset (>= pad)
    kernel = _make_fused_kernel(C, hw, k, pad, padq)
    spec = pl.BlockSpec((None, C, hw), lambda n, w_ref: (n, 0, 0))
    vmem_limit = int(min(max(fused_need, 16 << 20), usable))
    return pl.pallas_call(
        kernel,
        out_shape=jax.ShapeDtypeStruct((N, C, hw), x3.dtype),
        grid_spec=pltpu.PrefetchScalarGridSpec(
            num_scalar_prefetch=1,
            grid=(N,),
            in_specs=[spec],
            out_specs=spec,
            scratch_shapes=[pltpu.VMEM((C + 2 * padq, 1), jnp.float32)],
        ),
        compiler_params=pltpu.CompilerParams(
            dimension_semantics=("parallel",),
            vmem_limit_bytes=vmem_limit,
        ),
    )(w, x3)


def _rescale_kernel(x_ref, s_ref, o_ref):
    # x_ref: (tr, thw) native dtype; s_ref: (tr, 1) f32 per-channel scale.
    o_ref[...] = x_ref[...] * s_ref[...].astype(o_ref.dtype)


def _two_pass_path(x3, w, k, pad, usable):
    N, C, hw = x3.shape
    dsize = x3.dtype.itemsize

    # Pass (a): pool + channel conv + sigmoid over N*C values.  Deliberately
    # plain JAX (review-endorsed): the data is tiny and the overall cost is
    # dominated by the HBM-bound rescale pass below.
    pooled = jnp.mean(x3, axis=-1, dtype=jnp.float32)               # (N, C)
    pp = jnp.pad(pooled, ((0, 0), (pad, pad)))
    conv = pp[:, 0:C] * w[0]
    for j in range(1, k):
        conv = conv + pp[:, j:j + C] * w[j]
    scale = jax.nn.sigmoid(conv)                                    # (N, C) f32

    # Pass (b): streaming per-channel rescale, tiled so VMEM per step stays
    # bounded and both TensorCores / the DMA pipeline get real work.
    rows = N * C
    x2 = x3.reshape(rows, hw)
    s2 = scale.reshape(rows, 1)

    target_block = int(min(4 << 20, max(1 << 20, usable // 16)))
    row_bytes = hw * dsize
    tr = max(1, target_block // row_bytes)
    if tr >= rows:
        tr = rows
    else:
        tr = min(rows, max(8, (tr // 8) * 8))
    thw = hw
    if tr == 8 and 8 * row_bytes > target_block and hw % 128 == 0:
        thw = min(hw, max(128, ((target_block // (8 * dsize)) // 128) * 128))

    grid = (pl.cdiv(rows, tr), pl.cdiv(hw, thw))
    x_spec = pl.BlockSpec((tr, thw), lambda r, h: (r, h))
    s_spec = pl.BlockSpec((tr, 1), lambda r, h: (r, 0))
    block_bytes = tr * thw * dsize
    vmem_limit = int(min(max(4 * block_bytes + (2 << 20), 16 << 20), usable))

    out2 = pl.pallas_call(
        _rescale_kernel,
        out_shape=jax.ShapeDtypeStruct((rows, hw), x2.dtype),
        grid=grid,
        in_specs=[x_spec, s_spec],
        out_specs=x_spec,
        compiler_params=pltpu.CompilerParams(
            dimension_semantics=("parallel", "parallel"),
            vmem_limit_bytes=vmem_limit,
        ),
    )(x2, s2)
    return out2.reshape(N, C, hw)


def channel_att_forward(x: jax.Array, conv_weight: jax.Array, *,
                        force_tiled: bool = False) -> jax.Array:
    """Pallas equivalent of channel_att.forward(x).

    x:           (N, C, H, W)
    conv_weight: PyTorch Conv1d weight of shape (1, 1, k) (or (k,)), odd k,
                 padding (k-1)//2, no bias.
    """
    N, C, H, W = x.shape
    hw = H * W
    w = conv_weight.reshape(-1).astype(jnp.float32)
    k = int(w.shape[0])
    pad = (k - 1) // 2

    x3 = x.reshape(N, C, hw)                         # lane-dense spatial axis
    usable = _usable_vmem_bytes()
    dsize = x.dtype.itemsize
    fused_need = 4 * C * hw * dsize + (2 << 20)      # in+out double-buffered + slack

    if force_tiled or fused_need > usable:
        out3 = _two_pass_path(x3, w, k, pad, usable)
    else:
        out3 = _fused_path(x3, w, k, pad, usable, fused_need)
    return out3.reshape(N, C, H, W)


if __name__ == "__main__":
    key = jax.random.PRNGKey(0)
    kx, kw = jax.random.split(key)

    # Small NCHW test shape; channels=16 -> ECA kernel size 3 (non-trivial conv).
    N, C, H, W = 2, 16, 16, 16
    b_param, gamma = 1, 2
    ksize = int(abs((math.log(C, 2) + b_param) / gamma))
    ksize = ksize if ksize % 2 else ksize + 1

    x = jax.random.normal(kx, (N, C, H, W), dtype=jnp.float32)
    conv_w = jax.random.normal(kw, (1, 1, ksize), dtype=jnp.float32) * 0.5

    # Exercise both code paths (fused single-pass and tiled fallback).
    out_fused = jax.block_until_ready(channel_att_forward(x, conv_w))
    out_tiled = jax.block_until_ready(channel_att_forward(x, conv_w, force_tiled=True))

    # Plain-JAX reference (independent of the in-kernel formulation).
    pad = (ksize - 1) // 2
    wflat = conv_w.reshape(-1)
    y = jnp.mean(x, axis=(2, 3))                                  # (N, C)
    yp = jnp.pad(y, ((0, 0), (pad, pad)))
    conv = sum(wflat[j] * yp[:, j:j + C] for j in range(ksize))   # (N, C)
    att = jax.nn.sigmoid(conv)
    ref = x * att[:, :, None, None]

    assert out_fused.shape == ref.shape and out_fused.dtype == ref.dtype
    assert jnp.allclose(out_fused, ref, atol=1e-5, rtol=1e-5), "fused path mismatch"
    assert jnp.allclose(out_tiled, ref, atol=1e-5, rtol=1e-5), "tiled path mismatch"

    print("KERNEL_OK")
</pallas_src>

<mosaic_0001>
module attributes {stable_mosaic.version = 11 : i64} {
  func.func @kernel(%arg0: i32, %arg1: memref<3xf32, #tpu.memory_space<smem>>, %arg2: memref<1x16x256xf32, #tpu.memory_space<vmem>>, %arg3: memref<1x16x256xf32, #tpu.memory_space<vmem>>, %arg4: memref<32x1xf32, #tpu.memory_space<vmem>>) attributes {dimension_semantics = [#tpu.dimension_semantics<parallel>], iteration_bounds = array<i64: 2>, scalar_prefetch = 1 : i64, scratch_operands = 1 : i64, tpu.core_type = #tpu.core_type<tc>, window_params = [{transform_indices = @transform_0, window_bounds = array<i64: 1, 16, 256>}, {transform_indices = @transform_1, window_bounds = array<i64: 1, 16, 256>}]} {
    %c0 = arith.constant 0 : index
    %c0_0 = arith.constant 0 : index
    %c0_1 = arith.constant 0 : index
    %0 = vector.load %arg2[%c0, %c0_0, %c0_1] : memref<1x16x256xf32, #tpu.memory_space<vmem>>, vector<1x16x256xf32>
    %1 = vector.shape_cast %0 : vector<1x16x256xf32> to vector<16x256xf32>
    %cst = arith.constant dense<0.000000e+00> : vector<16xf32>
    %2 = vector.multi_reduction <add>, %1, %cst [1] : vector<16x256xf32> to vector<16xf32>
    %3 = vector.shape_cast %2 : vector<16xf32> to vector<16x1xf32>
    %cst_2 = arith.constant 3.906250e-03 : f32
    %4 = vector.broadcast %cst_2 : f32 to vector<16x1xf32>
    %5 = arith.mulf %3, %4 : vector<16x1xf32>
    %cst_3 = arith.constant 0.000000e+00 : f32
    %6 = vector.broadcast %cst_3 : f32 to vector<32x1xf32>
    %c0_4 = arith.constant 0 : index
    %c0_5 = arith.constant 0 : index
    %7 = vector.load %arg4[%c0_4, %c0_5] : memref<32x1xf32, #tpu.memory_space<vmem>>, vector<32x1xf32>
    tpu.vector_store %arg4[%c0_4, %c0_5], %6 {strides = array<i32>} : memref<32x1xf32, #tpu.memory_space<vmem>>, vector<32x1xf32>,
    %c8 = arith.constant 8 : index
    %c0_6 = arith.constant 0 : index
    %8 = vector.load %arg4[%c8, %c0_6] : memref<32x1xf32, #tpu.memory_space<vmem>>, vector<16x1xf32>
    tpu.vector_store %arg4[%c8, %c0_6], %5 {strides = array<i32>} : memref<32x1xf32, #tpu.memory_space<vmem>>, vector<16x1xf32>,
    %c0_7 = arith.constant 0 : index
    %9 = memref.load %arg1[%c0_7] : memref<3xf32, #tpu.memory_space<smem>>
    %c7 = arith.constant 7 : index
    %c0_8 = arith.constant 0 : index
    %10 = vector.load %arg4[%c7, %c0_8] : memref<32x1xf32, #tpu.memory_space<vmem>>, vector<16x1xf32>
    %11 = vector.broadcast %9 : f32 to vector<16x1xf32>
    %12 = arith.mulf %11, %10 : vector<16x1xf32>
    %c1 = arith.constant 1 : index
    %13 = memref.load %arg1[%c1] : memref<3xf32, #tpu.memory_space<smem>>
    %c8_9 = arith.constant 8 : index
    %c0_10 = arith.constant 0 : index
    %14 = vector.load %arg4[%c8_9, %c0_10] : memref<32x1xf32, #tpu.memory_space<vmem>>, vector<16x1xf32>
    %15 = vector.broadcast %13 : f32 to vector<16x1xf32>
    %16 = arith.mulf %15, %14 : vector<16x1xf32>
    %17 = arith.addf %12, %16 : vector<16x1xf32>
    %c2 = arith.constant 2 : index
    %18 = memref.load %arg1[%c2] : memref<3xf32, #tpu.memory_space<smem>>
    %c9 = arith.constant 9 : index
    %c0_11 = arith.constant 0 : index
    %19 = vector.load %arg4[%c9, %c0_11] : memref<32x1xf32, #tpu.memory_space<vmem>>, vector<16x1xf32>
    %20 = vector.broadcast %18 : f32 to vector<16x1xf32>
    %21 = arith.mulf %20, %19 : vector<16x1xf32>
    %22 = arith.addf %17, %21 : vector<16x1xf32>
    %cst_12 = arith.constant 0.000000e+00 : f32
    %23 = vector.broadcast %cst_12 : f32 to vector<16x1xf32>
    %24 = arith.subf %23, %22 : vector<16x1xf32>
    %25 = math.exp %24 : vector<16x1xf32>
    %cst_13 = arith.constant 1.000000e+00 : f32
    %26 = vector.broadcast %cst_13 : f32 to vector<16x1xf32>
    %27 = arith.addf %26, %25 : vector<16x1xf32>
    %cst_14 = arith.constant 1.000000e+00 : f32
    %28 = vector.broadcast %cst_14 : f32 to vector<16x1xf32>
    %29 = arith.divf %28, %27 : vector<16x1xf32>
    %30 = vector.broadcast %29 : vector<16x1xf32> to vector<16x256xf32>
    %31 = arith.mulf %1, %30 : vector<16x256xf32>
    %c0_15 = arith.constant 0 : index
    %c0_16 = arith.constant 0 : index
    %c0_17 = arith.constant 0 : index
    %32 = vector.load %arg3[%c0_15, %c0_16, %c0_17] : memref<1x16x256xf32, #tpu.memory_space<vmem>>, vector<1x16x256xf32>
    %33 = vector.shape_cast %32 : vector<1x16x256xf32> to vector<16x256xf32>
    %34 = vector.shape_cast %31 : vector<16x256xf32> to vector<1x16x256xf32>
    tpu.vector_store %arg3[%c0_15, %c0_16, %c0_17], %34 {strides = array<i32>} : memref<1x16x256xf32, #tpu.memory_space<vmem>>, vector<1x16x256xf32>,
    return
  }
  func.func @transform_0(%arg0: i32, %arg1: memref<3xf32, #tpu.memory_space<smem>>) -> (i32, i32, i32) {
    %c0_i32 = arith.constant 0 : i32
    %c0_i32_0 = arith.constant 0 : i32
    %c0_i32_1 = arith.constant 0 : i32
    return %arg0, %c0_i32, %c0_i32_0 : i32, i32, i32
  }
  func.func @transform_1(%arg0: i32, %arg1: memref<3xf32, #tpu.memory_space<smem>>) -> (i32, i32, i32) {
    %c0_i32 = arith.constant 0 : i32
    %c0_i32_0 = arith.constant 0 : i32
    %c0_i32_1 = arith.constant 0 : i32
    return %arg0, %c0_i32, %c0_i32_0 : i32, i32, i32
  }
}

</mosaic_0001>

<bundles_post_ra>
// kernel: tpu_custom_call.1
= control target key start
LH: loop header
LB: loop body
LE: loop exit
PB: predicated region body
PF: predicated region fallthrough
CT: control target
= control target key end

     0   :  { %s525_s12 = smov [#allocation4]   ;;  %s703_s0 = inlined_call_operand.hbm [shape: f32[3], index: 0, kind: input, shape index: {}]   ;;  %s704_s1 = inlined_call_operand.hbm [shape: f32[2,16,256], index: 1, kind: input, shape index: {}]   ;;  %s705_s2 = inlined_call_operand.hbm [shape: f32[2,16,256], index: 2, kind: output, shape index: {}]  }
   0x1   :  { %s8_s11 = sshll.u32 %s703_s0, 4  ;;  %s9_s11 = int_to_ptr.hbm [resolvable:$true] %s8_s11 }
   0x2   :  { %11 = dma.hbm_to_smem %s9_s11, 16, %s525_s12, [#allocation3] }
   0x3   :  { %499 = dma.done.wait [#allocation3], 16 }
   0x4   :  { %500 = vsyncadd [#allocation3], 4294967280 }
   0x5   :  { %14 = sfence }
   0x6   :  { %15 = vsyncpa [#allocation6], 0 }
   0x7   :  { %17 = vsyncpa [#allocation6 + $0x1], 0 }
   0x8   :  { %18 = vsyncpa [#allocation7], 0 }
   0x9   :  { %20 = vsyncpa [#allocation7 + $0x1], 0  ;;  %s550_s13 = smov 0   ;;  %s552_s14 = smov 0  }
   0xa   :  { %s554_s15 = smov 0   ;;  %s556_s16 = smov 0  }
   0xb LB: > { %s571_s0 = sadd.s32 4294967295, %s523_s16   ;;  %s332_s17 = sadd.s32 4294967294, %s523_s16   ;;  %s523_s16 = sphi %s556_s16, %s715_s16   ;;  %s519_s15 = sphi %s554_s15, %s714_s15   ;;  %s515_s14 = sphi %s552_s14, %s713_s14   ;;  %s511_s13 = sphi %s550_s13, %s712_s13  }
   0xc   : > { %s575_s18 = sadd.s32 1, %s523_s16   ;;  %s33_s19 = sadd.s32 1, %s519_s15 }
   0xd   : > { %s30_s20 = ssub.s32 %s523_s16, %s575_s18  ;;  %p40_p0 = scmp.ne.s32.totalorder %s519_s15, %s515_s14 }
   0xe   : > { %p31_p1 = scmp.eq.s32.totalorder %s30_s20, 0  ;;  %p41_p2 = scmp.eq.s32.totalorder %s523_s16, 0 }
   0xf   : > { %p46_p3 = scmp.ne.s32.totalorder %s515_s14, %s511_s13  ;;  %p47_p4 = scmp.eq.s32.totalorder %s571_s0, 0 }
  0x10   : > { %s587_s21 = scalar_select %p31_p1, %s519_s15, %s33_s19  }
  0x11   : > { %p589_p5 = por %p41_p2, %p40_p0  ;;  %p593_p6 = por %p47_p4, %p46_p3 }
  0x12   : > { %p70_p7 = scmp.eq.s32.totalorder %s571_s0, 1  ;;  %p76_p8 = scmp.eq.s32.totalorder %s332_s17, 1 }
  0x13   : > { %p362_p10 = scmp.lt.s32.totalorder %s523_s16, 2  ;;  %s96_s26 = sand.u32 1, %s519_s15  }
  0x14   : > { %p600_p11 = por %p70_p7, %p40_p0  ;;  %p604_p12 = por %p76_p8, %p46_p3 }
  0x15   : > { %s348_s27 = sshll.u32 %s523_s16, 5  ;;  %s335_s28 = sshll.u32 %s96_s26, 5 }
  0x16   : > { %s105_s3 = scalar_lea.hbm %s704_s1, %s348_s27  ;;  %s100_s5 = scalar_lea.vmem [#allocation5], %s335_s28 }
  0x17   : > { %s106_s4 = sshll.u32 %s105_s3, 4  ;;  %s108_s6 = sshll.u32 %s100_s5, 4  ;;  %s107_s4 = int_to_ptr.hbm [resolvable:$true] %s106_s4  ;;  %s109_s6 = int_to_ptr.vmem [resolvable:$true] %s108_s6 }
  0x18   : > { %p615_p13 = pnand %p362_p10, %p589_p5  ;;  %p338_p0 = scmp.ge.s32.totalorder %s523_s16, 1 }
  0x19   : > { %p116_p1 = scmp.lt.s32.totalorder %s523_s16, 3  ;;  %s97_s8 = scalar_lea.sflag [#allocation6], %s96_s26 }
  0x1a   : > { %s425_s9 = sshra.s32 %s107_s4, 4  ;;  %p429_p3 = pneg %p615_p13  ;;  %s426_s9 = int_to_ptr.hbm [resolvable:$true] %s425_s9 }
  0x1b   : > { %s427_s10 = scalar_lea.hbm %s426_s9, 32  ;;  %s432_s17 = scalar_lea.hbm %s704_s1, 64 }
  0x1c   : > { %p428_p2 = scmp.ne.s32.totalorder %s426_s9, %s427_s10  ;;  %p433_p5 = scmp.lt.s32.totalorder %s426_s9, %s704_s1 }
  0x1d   : > { %p434_p8 = scmp.lt.s32.totalorder %s432_s17, %s427_s10 }
  0x1e   : > { %p430_p4 = pnand %p429_p3, %p428_p2 }
  0x1f   : > { %p435_p10 = por %p434_p8, %p433_p5 }
  0x20   : > { %p431_p7 = pneg %p430_p4 }
  0x22   : > { %p436_p9 = pnand %p435_p10, %p431_p7 }
  0x24   : > { %439 = shalt.err (!%p436_p9)
}
  0x25   : > { %s526_s22 = smov 256   ;;  %s527_s26 = smov 16  }
  0x26   : > { %357 = dma.hbm_to_vmem [thread:$0]  (!%p615_p13), %s107_s4, 512, %s109_s6, %s97_s8, %s526_s22, %s526_s22, %s527_s26  }
  0x27   : > { %p117_p2 = pnand %p338_p0, %p116_p1 }
  0x28   : > { %s636_s27 = sand.u32 (!%p117_p2), 1, %s515_s14  }
  0x29   : > { %120 = sbr.rel (%p117_p2) target bundleno = 348 (0x15c), region = 24  ;;  %s339_s28 = sshll.u32 (!%p117_p2), %s636_s27, 5 }
  0x2a   : > { %s123_s29 = scalar_lea.sflag (!%p117_p2), [#allocation6], %s636_s27  ;;  %s126_s30 = scalar_lea.vmem (!%p117_p2), [#allocation5], %s339_s28 }
  0x2e   : > { %502 = dma.done.wait (%p593_p6), %s123_s29, 512  }
  0x2f   : > { %504 = vsyncadd (%p593_p6), %s123_s29, 4294966784  ;;  %vm158_vm0 = vcmask 7168   ;;  %v528_v0 = vmov 0.0   ;;  %v650_v1 = vld [vmem:[%s126_s30] sm:$0xff]  ;;  %v652_v2 = vld [vmem:[%s126_s30 + $0x8] sm:$0xff]  ;;  %v529_v7 = vmov 0  }
  0x30   : > { %159 = vst.msk [vmem:[#allocation2] sm:$0xff] %vm158_vm0, %v528_v0  ;;  %v150_v3 = vadd.f32 %v652_v2, %v650_v1  ;;  %v656_v4 = vld [vmem:[%s126_s30 + $0x10] sm:$0xff]  ;;  %v658_v5 = vld [vmem:[%s126_s30 + $0x18] sm:$0xff]  ;;  %403 = vset.pattern.permute.xlu1 %v529_v7  ;;  %404 = vset.pattern.permute.xlu0 %v529_v7  ;;  %s165_s23 = sld [smem:[#allocation4]]  ;;  %s349_s5 = sshll.u32 %s571_s0, 5 }
  0x31   : > { %160 = vst.msk [vmem:[#allocation2 + $0x8] sm:$0xff] %vm158_vm0, %v528_v0  ;;  %v153_v6 = vadd.f32 %v658_v5, %v656_v4  ;;  %s341_s3 = sld [smem:[#allocation4 + $0x1]]  ;;  %s145_s6 = scalar_lea.vmem [#allocation8], %s339_s28 }
  0x32   : > { %162 = vst.msk [vmem:[#allocation2 + $0x18] sm:$0xff] %vm158_vm0, %v528_v0  ;;  %151 = vadd.xlane.f32.xlu0 %v150_v3  ;;  %s342_s4 = sld [smem:[#allocation4 + $0x2]]  ;;  %s255_s9 = scalar_lea.hbm %s705_s2, %s349_s5 }
  0x33   : > { %161 = vst.msk [vmem:[#allocation2 + $0x10] sm:$0xff] %vm158_vm0, %v528_v0  ;;  %s256_s10 = sshll.u32 %s145_s6, 4  ;;  %s258_s11 = sshll.u32 %s255_s9, 4  ;;  %s257_s10 = int_to_ptr.vmem [resolvable:$true] %s256_s10  ;;  %s259_s11 = int_to_ptr.hbm [resolvable:$true] %s258_s11 }
  0x34   : > { %s244_s0 = scalar_lea.sflag [#allocation7], %s636_s27  ;;  %s469_s12 = sshra.s32 %s259_s11, 4  ;;  %s470_s12 = int_to_ptr.hbm [resolvable:$true] %s469_s12 }
  0x35   : > { %s471_s17 = scalar_lea.hbm %s470_s12, 32  ;;  %s475_s22 = scalar_lea.hbm %s705_s2, 64 }
  0x36   : > { %v168_v13 = vstv %s165_s23  ;;  %p472_p6 = scmp.ne.s32.totalorder %s470_s12, %s471_s17  ;;  %p476_p0 = scmp.lt.s32.totalorder %s470_s12, %s705_s2 }
  0x37   : > { %v174_v15 = vstv %s341_s3  ;;  %p477_p1 = scmp.lt.s32.totalorder %s475_s22, %s471_s17 }
  0x38   : > { %v182_v18 = vstv %s342_s4  ;;  %p473_p9 = pnand %p472_p6, %p600_p11 }
  0x39   : > { %p478_p3 = por %p477_p1, %p476_p0 }
  0x3a   : > { %154 = vadd.xlane.f32.xlu0 %v153_v6  ;;  %p474_p13 = pneg %p473_p9 }
  0x3c   : > { %p479_p4 = pnand %p478_p3, %p474_p13 }
  0xa5   : > { %v152_v8 = vpop.xlane.xlu0 %151 }
  0xa6   : > { %v156_v9 = vmul.f32 0.00390625, %v152_v8 }
  0xa8   : > { %163 = vst.msk [vmem:[#allocation2 + $0x8] sm:$0xff] %vm158_vm0, %v156_v9 }
  0xad   : > { %v155_v10 = vpop.xlane.xlu0 %154 }
  0xae   : > { %v157_v11 = vmul.f32 0.00390625, %v155_v10 }
  0xaf   : > { %v166_v12 = vld [vmem:[#allocation2 + $0x7] sm:$0xff] }
  0xb0   : > { %164 = vst.msk [vmem:[#allocation2 + $0x10] sm:$0xff] %vm158_vm0, %v157_v11  ;;  %v172_v14 = vld [vmem:[#allocation2 + $0x8] sm:$0xff]  ;;  %v169_v16 = vmul.f32 %v168_v13, %v166_v12 }
  0xb1   : > { %v175_v17 = vmul.f32 %v174_v15, %v172_v14 }
  0xb3   : > { %v177_v22 = vadd.f32 %v175_v17, %v169_v16 }
  0xb7   : > { %v180_v19 = vld [vmem:[#allocation2 + $0x9] sm:$0xff]  ;;  %v181_v26 = vld [vmem:[#allocation2 + $0x11] sm:$0xff] }
  0xb8   : > { %v167_v20 = vld [vmem:[#allocation2 + $0xf] sm:$0xff]  ;;  %v183_v23 = vmul.f32 %v182_v18, %v180_v19  ;;  %v184_v29 = vmul.f32 %v182_v18, %v181_v26 }
  0xb9   : > { %v173_v21 = vld [vmem:[#allocation2 + $0x10] sm:$0xff]  ;;  %v170_v24 = vmul.f32 %v168_v13, %v167_v20 }
  0xba   : > { %v176_v25 = vmul.f32 %v174_v15, %v173_v21  ;;  %v185_v27 = vadd.f32 %v183_v23, %v177_v22 }
  0xbc   : > { %v178_v28 = vadd.f32 %v176_v25, %v170_v24  ;;  %v187_v30 = vsub.f32 0.0, %v185_v27 }
  0xbe   : > { %v186_v31 = vadd.f32 %v184_v29, %v178_v28  ;;  %v189_v32 = vmul.f32 1.442695, %v187_v30 }
  0xc0   : > { %v188_v33 = vsub.f32 0.0, %v186_v31  ;;  %405 = vpow2.f32 %v189_v32 }
  0xc2   : > { %v191_v34 = vmul.f32 1.442695, %v188_v33 }
  0xc4   : > { %407 = vpow2.f32 %v191_v34 }
  0xc6   : > { %v406_v35 = vpop.eup %405 }
  0xc7   : > { %v193_v36 = vadd.f32 1.0, %v406_v35 }
  0xc9   : > { %409 = vrcp.f32 %v193_v36  ;;  %v206_v43 = vand.u32 2147483648, %v193_v36  ;;  %v204_v46 = vand.u32 2147483647, %v193_v36  ;;  %vm200_vm2 = vweird.f32 %v193_v36 }
  0xca   : > { %v408_v37 = vpop.eup %407 }
  0xcb   : > { %v194_v38 = vadd.f32 1.0, %v408_v37  ;;  %v207_v49 = vor.u32 1.1754944e-38, %v206_v43  ;;  %vm205_vm4 = vcmp.eq.f32.partialorder %v204_v46, 8.507059e+37 }
  0xcd   : > { %411 = vrcp.f32 %v194_v38  ;;  %v221_v54 = vand.u32 2147483648, %v194_v38  ;;  %vm215_vm6 = vweird.f32 %v194_v38  ;;  %v219_v55 = vand.u32 2147483647, %v194_v38 }
  0xcf   : > { %v410_v39 = vpop.eup %409  ;;  %v222_v57 = vor.u32 1.1754944e-38, %v221_v54  ;;  %vm220_vm8 = vcmp.eq.f32.partialorder %v219_v55, 8.507059e+37 }
  0xd0   : > { %v196_v40 = vmul.f32 %v410_v39, %v193_v36  ;;  %vm201_vm1 = vweird.f32 %v410_v39 }
  0xd1   : > { %vm202_vm3 = vmor %vm200_vm2, %vm201_vm1 }
  0xd2   : > { %v197_v42 = vsub.f32 1.0, %v196_v40 }
  0xd3   : > { %v412_v41 = vpop.eup %411 }
  0xd4   : > { %v211_v44 = vmul.f32 %v412_v41, %v194_v38  ;;  %v198_v45 = vmul.f32 %v410_v39, %v197_v42  ;;  %vm216_vm5 = vweird.f32 %v412_v41 }
  0xd5   : > { %vm217_vm7 = vmor %vm215_vm6, %vm216_vm5 }
  0xd6   : > { %v212_v47 = vsub.f32 1.0, %v211_v44  ;;  %v199_v48 = vadd.f32 %v410_v39, %v198_v45 }
  0xd8   : > { %v213_v50 = vmul.f32 %v412_v41, %v212_v47  ;;  %v203_v51 = vsel %vm202_vm3, %v410_v39, %v199_v48 }
  0xd9   : > { %v208_v52 = vsel %vm205_vm4, %v207_v49, %v203_v51 }
  0xda   : > { %227 = vperm.xlu1 %403, %v208_v52   ;;  %v214_v53 = vadd.f32 %v412_v41, %v213_v50 }
  0xdc   : > { %v218_v56 = vsel %vm217_vm7, %v412_v41, %v214_v53 }
  0xdd   : > { %v223_v58 = vsel %vm220_vm8, %v222_v57, %v218_v56 }
  0xe2   : > { %232 = vperm.xlu1 %403, %v223_v58  }
 0x14c   : > { %v228_v59 = vpop.permute.xlu1 %227 }
 0x14d   : > { %v235_v60 = vmul.f32 %v228_v59, %v650_v1  ;;  %v236_v61 = vmul.f32 %v228_v59, %v652_v2 }
 0x14f   : > { %239 = vst [vmem:[%s145_s6] sm:$0xff] %v235_v60 }
 0x150   : > { %240 = vst [vmem:[%s145_s6 + $0x8] sm:$0xff] %v236_v61 }
 0x154   : > { %v233_v62 = vpop.permute.xlu1 %232 }
 0x155   : > { %v237_v63 = vmul.f32 %v233_v62, %v656_v4  ;;  %v238_v0 = vmul.f32 %v233_v62, %v658_v5 }
 0x157   : > { %241 = vst [vmem:[%s145_s6 + $0x10] sm:$0xff] %v237_v63 }
 0x158   : > { %242 = vst [vmem:[%s145_s6 + $0x18] sm:$0xff] %v238_v0 }
 0x159   : > { %482 = shalt.err (!%p479_p4)
}
 0x15a   : > { %s530_s27 = smov 256   ;;  %s531_s29 = smov 16  }
 0x15b   : > { %352 = dma.vmem_to_hbm [thread:$0]  (%p600_p11), %s257_s10, 512, %s259_s11, %s244_s0, %s530_s27, %s530_s27, %s531_s29  }
 0x15c PF: > { %s273_s30 = sand.u32 1, %s511_s13   ;;  %p711_p7 = scmp.ge.s32.totalorder %s523_s16, 2 }
 0x15d   : > { %s274_s23 = scalar_lea.sflag [#allocation7], %s273_s30 }
 0x15e   : > { %p359_p5 = pnand %p711_p7, %p604_p12 }
 0x160   : > { %p360_p8 = pneg %p359_p5 }
 0x162   : > { %506 = dma.done.wait (%p360_p8), %s274_s23, 512  }
 0x163   : > { %508 = vsyncadd (%p360_p8), %s274_s23, 4294966784  ;;  %p23_p10 = scmp.ge.s32.totalorder %s575_s18, 4   ;;  %s712_s13 = smov %s515_s14 }
 0x164   : > { %s713_s14 = smov %s519_s15  ;;  %s714_s15 = smov %s587_s21 }
 0x165   : > { %s715_s16 = smov %s575_s18  ;;  %25 = sbr.rel (!%p23_p10) target bundleno = 11 (0xb), region = 69 }
 0x16a   :  { %280 = vsyncpa [#allocation6], 1 }
 0x16b   :  { %282 = vsyncpa [#allocation6 + $0x1], 1 }
 0x16c   :  { %283 = vsyncpa [#allocation7], 1 }
 0x16d   :  { %285 = vsyncpa [#allocation7 + $0x1], 1 }

</bundles_post_ra>
